<compile_context>
chip_gen: v7x
topology: tpu7x:2x2x1
jax: 0.10.0
libtpu: 0.0.40
codegen_flags: <defaults>
</compile_context>

<pallas_src>
import functools
import math

import jax
import jax.numpy as jnp
from jax.experimental import pallas as pl
from jax.experimental.pallas import tpu as pltpu


def _attention_decoder_kernel(x_ref, mask_ref, wkv_ref, bkv_ref, qproj_ref,
                              blkmask_ref, out_ref, *, heads, value_size,
                              out_len, seq_len, bblk):
    H, O, V, T = heads, out_len, value_size, seq_len
    HV, HO = H * V, H * O

    x = x_ref[...].reshape(bblk * T, -1)                      # (Bblk*T, C)

    # Fused key+value projection: one MXU call, one packed bias row.
    kv = jnp.dot(x, wkv_ref[...],
                 preferred_element_type=jnp.float32) + bkv_ref[...]   # (Bblk*T, HV+HK)

    # Scores for all batches & heads at once: block-diagonal (scaled) queries,
    # zero-padded over the value columns of kv -> no lane slicing of the keys.
    s = jnp.dot(kv, qproj_ref[...],
                preferred_element_type=jnp.float32)           # (Bblk*T, H*O)
    s = s.reshape(bblk, T, HO)

    # Additive key mask, then numerically stable softmax over key positions t.
    s = s + (-1e8) * (1.0 - mask_ref[...])                    # mask: (Bblk, T, 1)
    s = s - jnp.max(s, axis=1, keepdims=True)
    e = jnp.exp(s)
    denom = jnp.sum(e, axis=1, keepdims=True)                 # (Bblk, 1, HO)
    p = e * pl.reciprocal(denom, approx=False)                # divide -> EUP recip

    # Batched P @ V for all heads at once; cross-head terms are computed and
    # then removed with the static head-block mask (HO, HV are tiny).
    values = kv[:, :HV].reshape(bblk, T, HV)                  # prefix lane slice
    cross = jnp.einsum("btq,btv->bqv", p, values,
                       preferred_element_type=jnp.float32)    # (Bblk, HO, HV)
    out = (cross * blkmask_ref[...]).reshape(bblk, H, O, HV).sum(axis=1)
    out_ref[...] = out.astype(out_ref.dtype)                  # (Bblk, O, HV)


def _tensorcores_per_chip():
    try:
        kind = jax.devices()[0].device_kind.lower()
    except Exception:
        return 1
    # v7x: 2 TensorCores/chip; v4/v5p megacore also shards "parallel" grid axes.
    if "v7" in kind or "v5p" in kind or "v4" in kind:
        return 2
    return 1


def attention_decoder_pallas(x, mask, params, *, heads, key_size, value_size,
                             output_sequence_length):
    """x: (B, T, C) f32, mask: (B, T) uint8/float. Returns (B, O, H*V) f32."""
    B, T, C = x.shape
    O = output_sequence_length
    HK, HV, HO = heads * key_size, heads * value_size, heads * O

    # --- grid blocking: amortize the ~0.35us/step pipeline cost -------------
    num_steps = max(1, min(_tensorcores_per_chip(), B))
    bblk = -(-B // num_steps)                 # ceil(B / num_steps)
    b_pad = num_steps * bblk

    mask_f = mask.astype(jnp.float32).reshape(B, T, 1)
    if b_pad != B:
        x = jnp.pad(x, ((0, b_pad - B), (0, 0), (0, 0)))
        mask_f = jnp.pad(mask_f, ((0, b_pad - B), (0, 0), (0, 0)),
                         constant_values=1.0)

    # --- constant operands (VMEM-resident across all grid steps) ------------
    # nn.Linear stores W as (out, in); fuse value+key -> (C, HV+HK), one bias row.
    w_kv = jnp.concatenate([params["wv"].T, params["wk"].T], axis=1)   # (C, HV+HK)
    b_kv = jnp.concatenate([params["bv"], params["bk"]],
                           axis=0).reshape(1, HV + HK)

    # Block-diagonal query projection (key scale folded in): column h*O+o holds
    # the scaled query q[o,h,:] in the key rows of head h, zeros elsewhere
    # (including the HV value rows), so scores = kv @ q_proj in one matmul.
    scale = math.sqrt(1.0 / key_size)
    q_t = jnp.transpose(params["queries"] * scale, (1, 2, 0))          # (H, K, O)
    q_bd = jnp.einsum("hko,hg->hkgo", q_t,
                      jnp.eye(heads, dtype=jnp.float32)).reshape(HK, HO)
    q_proj = jnp.concatenate(
        [jnp.zeros((HV, HO), jnp.float32), q_bd], axis=0)              # (HV+HK, HO)

    # 0/1 mask selecting the per-head diagonal (O, V) blocks of the P@V result.
    blk_mask = (jnp.arange(HO)[:, None] // O
                == jnp.arange(HV)[None, :] // value_size).astype(jnp.float32)

    kernel = functools.partial(
        _attention_decoder_kernel, heads=heads, value_size=value_size,
        out_len=O, seq_len=T, bblk=bblk)

    grid_spec = pltpu.PrefetchScalarGridSpec(
        num_scalar_prefetch=0,
        grid=(num_steps,),
        in_specs=[
            pl.BlockSpec((bblk, T, C), lambda b: (b, 0, 0)),      # x (Bblk batches/step)
            pl.BlockSpec((bblk, T, 1), lambda b: (b, 0, 0)),      # float mask
            pl.BlockSpec((C, HV + HK), lambda b: (0, 0)),         # fused W_kv (resident)
            pl.BlockSpec((1, HV + HK), lambda b: (0, 0)),         # fused bias (resident)
            pl.BlockSpec((HV + HK, HO), lambda b: (0, 0)),        # block-diag queries
            pl.BlockSpec((HO, HV), lambda b: (0, 0)),             # head-block mask
        ],
        out_specs=pl.BlockSpec((bblk, O, HV), lambda b: (b, 0, 0)),   # final layout
    )

    out = pl.pallas_call(
        kernel,
        out_shape=jax.ShapeDtypeStruct((b_pad, O, HV), jnp.float32),
        grid_spec=grid_spec,
        compiler_params=pltpu.CompilerParams(
            dimension_semantics=("parallel",)),                   # shard steps over TCs
    )(x, mask_f, w_kv, b_kv, q_proj, blk_mask)
    return out[:B] if b_pad != B else out


def attention_decoder_reference(x, mask, params, *, heads, key_size, value_size,
                                output_sequence_length):
    """Pure-JAX mirror of the PyTorch forward."""
    B, T, C = x.shape
    scale = math.sqrt(1.0 / key_size)
    keys = (x @ params["wk"].T + params["bk"]).reshape(B, T, heads, key_size) * scale
    values = (x @ params["wv"].T + params["bv"]).reshape(B, T, heads, value_size)
    q = params["queries"]                                                # (O, H, K)
    scores = jnp.einsum("ohk,bthk->both", q, keys)                       # (B, O, T, H)
    fm = mask.astype(jnp.float32)
    scores = scores - 1e8 * (1.0 - fm)[:, None, :, None]
    scores = jax.nn.softmax(scores, axis=2)                              # softmax over T
    attn = jnp.einsum("both,bthv->bohv", scores, values)                 # (B, O, H, V)
    return attn.reshape(B, output_sequence_length, heads * value_size)


if __name__ == "__main__":
    # Small config consistent with AttentionDecoder.__init__
    max_sequence_length = 16     # T
    input_size = 32              # C
    heads = 2
    key_size = 4
    value_size = 8
    output_sequence_length = 8   # O
    B = 2
    HK, HV = heads * key_size, heads * value_size

    key = jax.random.PRNGKey(0)
    ks = jax.random.split(key, 8)

    s = 1.0 / math.sqrt(input_size)
    params = {
        "wk": jax.random.uniform(ks[0], (HK, input_size), jnp.float32, -s, s),
        "bk": jax.random.uniform(ks[1], (HK,), jnp.float32, -s, s),
        "wv": jax.random.uniform(ks[2], (HV, input_size), jnp.float32, -s, s),
        "bv": jax.random.uniform(ks[3], (HV,), jnp.float32, -s, s),
        "queries": jax.random.normal(
            ks[4], (output_sequence_length, heads, key_size), jnp.float32),
    }

    x = jax.random.normal(ks[5], (B, max_sequence_length, input_size), jnp.float32)
    mask = (jax.random.uniform(ks[6], (B, max_sequence_length)) > 0.25).astype(jnp.uint8)

    out = attention_decoder_pallas(
        x, mask, params, heads=heads, key_size=key_size, value_size=value_size,
        output_sequence_length=output_sequence_length)
    out = jax.block_until_ready(out)

    ref = attention_decoder_reference(
        x, mask, params, heads=heads, key_size=key_size, value_size=value_size,
        output_sequence_length=output_sequence_length)

    assert out.shape == (B, output_sequence_length, heads * value_size)
    assert jnp.allclose(out, ref, rtol=1e-5, atol=1e-5), "mismatch vs JAX reference"

    print("KERNEL_OK")
</pallas_src>

<mosaic_0001>
module attributes {stable_mosaic.version = 11 : i64} {
  func.func @_attention_decoder_kernel(%arg0: i32, %arg1: memref<2x16x32xf32, #tpu.memory_space<vmem>>, %arg2: memref<2x16x1xf32, #tpu.memory_space<vmem>>, %arg3: memref<32x24xf32, #tpu.memory_space<vmem>>, %arg4: memref<1x24xf32, #tpu.memory_space<vmem>>, %arg5: memref<24x16xf32, #tpu.memory_space<vmem>>, %arg6: memref<16x16xf32, #tpu.memory_space<vmem>>, %arg7: memref<2x8x16xf32, #tpu.memory_space<vmem>>) attributes {dimension_semantics = [#tpu.dimension_semantics<parallel>], iteration_bounds = array<i64: 1>, scalar_prefetch = 0 : i64, scratch_operands = 0 : i64, tpu.core_type = #tpu.core_type<tc>, window_params = [{transform_indices = @transform_0, window_bounds = array<i64: 2, 16, 32>}, {transform_indices = @transform_1, window_bounds = array<i64: 2, 16, 1>}, {pipeline_mode = #tpu.pipeline_mode<synchronous>, transform_indices = @transform_2, window_bounds = array<i64: 32, 24>}, {pipeline_mode = #tpu.pipeline_mode<synchronous>, transform_indices = @transform_3, window_bounds = array<i64: 1, 24>}, {pipeline_mode = #tpu.pipeline_mode<synchronous>, transform_indices = @transform_4, window_bounds = array<i64: 24, 16>}, {pipeline_mode = #tpu.pipeline_mode<synchronous>, transform_indices = @transform_5, window_bounds = array<i64: 16, 16>}, {transform_indices = @transform_6, window_bounds = array<i64: 2, 8, 16>}]} {
    %c0 = arith.constant 0 : index
    %c0_0 = arith.constant 0 : index
    %c0_1 = arith.constant 0 : index
    %0 = vector.load %arg1[%c0, %c0_0, %c0_1] : memref<2x16x32xf32, #tpu.memory_space<vmem>>, vector<2x16x32xf32>
    %1 = vector.shape_cast %0 : vector<2x16x32xf32> to vector<32x32xf32>
    %c0_2 = arith.constant 0 : index
    %c0_3 = arith.constant 0 : index
    %2 = vector.load %arg3[%c0_2, %c0_3] : memref<32x24xf32, #tpu.memory_space<vmem>>, vector<32x24xf32>
    %cst = arith.constant dense<0.000000e+00> : vector<32x24xf32>
    %3 = tpu.matmul %1, %2, %cst {dimension_numbers = #tpu.dot_dimension_numbers<[1], [0], [0], [1], [0, 0, 1, 1], [], []>} : vector<32x32xf32>, vector<32x24xf32>, vector<32x24xf32> -> vector<32x24xf32>
    %c0_4 = arith.constant 0 : index
    %c0_5 = arith.constant 0 : index
    %4 = vector.load %arg4[%c0_4, %c0_5] : memref<1x24xf32, #tpu.memory_space<vmem>>, vector<1x24xf32>
    %5 = vector.broadcast %4 : vector<1x24xf32> to vector<32x24xf32>
    %6 = arith.addf %3, %5 : vector<32x24xf32>
    %c0_6 = arith.constant 0 : index
    %c0_7 = arith.constant 0 : index
    %7 = vector.load %arg5[%c0_6, %c0_7] : memref<24x16xf32, #tpu.memory_space<vmem>>, vector<24x16xf32>
    %cst_8 = arith.constant dense<0.000000e+00> : vector<32x16xf32>
    %8 = tpu.matmul %6, %7, %cst_8 {dimension_numbers = #tpu.dot_dimension_numbers<[1], [0], [0], [1], [0, 0, 1, 1], [], []>} : vector<32x24xf32>, vector<24x16xf32>, vector<32x16xf32> -> vector<32x16xf32>
    %9 = vector.shape_cast %8 : vector<32x16xf32> to vector<2x16x16xf32>
    %c0_9 = arith.constant 0 : index
    %c0_10 = arith.constant 0 : index
    %c0_11 = arith.constant 0 : index
    %10 = vector.load %arg2[%c0_9, %c0_10, %c0_11] : memref<2x16x1xf32, #tpu.memory_space<vmem>>, vector<2x16x1xf32>
    %cst_12 = arith.constant 1.000000e+00 : f32
    %11 = vector.broadcast %cst_12 : f32 to vector<2x16x1xf32>
    %12 = arith.subf %11, %10 : vector<2x16x1xf32>
    %cst_13 = arith.constant -1.000000e+08 : f32
    %13 = vector.broadcast %cst_13 : f32 to vector<2x16x1xf32>
    %14 = arith.mulf %13, %12 : vector<2x16x1xf32>
    %15 = vector.broadcast %14 : vector<2x16x1xf32> to vector<2x16x16xf32>
    %16 = arith.addf %9, %15 : vector<2x16x16xf32>
    %cst_14 = arith.constant dense<0xFF800000> : vector<2x16xf32>
    %17 = vector.multi_reduction <maximumf>, %16, %cst_14 [1] : vector<2x16x16xf32> to vector<2x16xf32>
    %18 = vector.shape_cast %17 : vector<2x16xf32> to vector<2x1x16xf32>
    %19 = vector.broadcast %18 : vector<2x1x16xf32> to vector<2x16x16xf32>
    %20 = arith.subf %16, %19 : vector<2x16x16xf32>
    %21 = math.exp %20 : vector<2x16x16xf32>
    %cst_15 = arith.constant dense<0.000000e+00> : vector<2x16xf32>
    %22 = vector.multi_reduction <add>, %21, %cst_15 [1] : vector<2x16x16xf32> to vector<2x16xf32>
    %23 = vector.shape_cast %22 : vector<2x16xf32> to vector<2x1x16xf32>
    %24 = tpu.reciprocal %23 : vector<2x1x16xf32> -> vector<2x1x16xf32>
    %25 = vector.broadcast %24 : vector<2x1x16xf32> to vector<2x16x16xf32>
    %26 = arith.mulf %21, %25 : vector<2x16x16xf32>
    %27 = vector.extract_strided_slice %6 {offsets = [0, 0], sizes = [32, 16], strides = [1, 1]} : vector<32x24xf32> to vector<32x16xf32>
    %28 = vector.shape_cast %27 : vector<32x16xf32> to vector<2x16x16xf32>
    "tpu.trace_start"() <{level = 10 : i32, message = "btq,btv->bqv"}> : () -> ()
    %cst_16 = arith.constant dense<0.000000e+00> : vector<2x16x16xf32>
    %29 = tpu.matmul %26, %28, %cst_16 {dimension_numbers = #tpu.dot_dimension_numbers<[1], [1], [2], [2], [0, 0, 0, 2, 1, 2], [0], [0]>} : vector<2x16x16xf32>, vector<2x16x16xf32>, vector<2x16x16xf32> -> vector<2x16x16xf32>
    "tpu.trace_stop"() : () -> ()
    %c0_17 = arith.constant 0 : index
    %c0_18 = arith.constant 0 : index
    %30 = vector.load %arg6[%c0_17, %c0_18] : memref<16x16xf32, #tpu.memory_space<vmem>>, vector<16x16xf32>
    %31 = vector.shape_cast %30 : vector<16x16xf32> to vector<1x16x16xf32>
    %32 = vector.broadcast %31 : vector<1x16x16xf32> to vector<2x16x16xf32>
    %33 = arith.mulf %29, %32 : vector<2x16x16xf32>
    %34 = vector.shape_cast %33 : vector<2x16x16xf32> to vector<2x2x8x16xf32>
    %cst_19 = arith.constant dense<0.000000e+00> : vector<2x8x16xf32>
    %35 = vector.multi_reduction <add>, %34, %cst_19 [1] : vector<2x2x8x16xf32> to vector<2x8x16xf32>
    %c0_20 = arith.constant 0 : index
    %c0_21 = arith.constant 0 : index
    %c0_22 = arith.constant 0 : index
    %36 = vector.load %arg7[%c0_20, %c0_21, %c0_22] : memref<2x8x16xf32, #tpu.memory_space<vmem>>, vector<2x8x16xf32>
    tpu.vector_store %arg7[%c0_20, %c0_21, %c0_22], %35 {strides = array<i32>} : memref<2x8x16xf32, #tpu.memory_space<vmem>>, vector<2x8x16xf32>,
    return
  }
  func.func @transform_0(%arg0: i32) -> (i32, i32, i32) {
    %c0_i32 = arith.constant 0 : i32
    %c0_i32_0 = arith.constant 0 : i32
    %c0_i32_1 = arith.constant 0 : i32
    return %arg0, %c0_i32, %c0_i32_0 : i32, i32, i32
  }
  func.func @transform_1(%arg0: i32) -> (i32, i32, i32) {
    %c0_i32 = arith.constant 0 : i32
    %c0_i32_0 = arith.constant 0 : i32
    %c0_i32_1 = arith.constant 0 : i32
    return %arg0, %c0_i32, %c0_i32_0 : i32, i32, i32
  }
  func.func @transform_2(%arg0: i32) -> (i32, i32) {
    %c0_i32 = arith.constant 0 : i32
    %c0_i32_0 = arith.constant 0 : i32
    %c0_i32_1 = arith.constant 0 : i32
    return %c0_i32, %c0_i32_0 : i32, i32
  }
  func.func @transform_3(%arg0: i32) -> (i32, i32) {
    %c0_i32 = arith.constant 0 : i32
    %c0_i32_0 = arith.constant 0 : i32
    %c0_i32_1 = arith.constant 0 : i32
    return %c0_i32, %c0_i32_0 : i32, i32
  }
  func.func @transform_4(%arg0: i32) -> (i32, i32) {
    %c0_i32 = arith.constant 0 : i32
    %c0_i32_0 = arith.constant 0 : i32
    %c0_i32_1 = arith.constant 0 : i32
    return %c0_i32, %c0_i32_0 : i32, i32
  }
  func.func @transform_5(%arg0: i32) -> (i32, i32) {
    %c0_i32 = arith.constant 0 : i32
    %c0_i32_0 = arith.constant 0 : i32
    %c0_i32_1 = arith.constant 0 : i32
    return %c0_i32, %c0_i32_0 : i32, i32
  }
  func.func @transform_6(%arg0: i32) -> (i32, i32, i32) {
    %c0_i32 = arith.constant 0 : i32
    %c0_i32_0 = arith.constant 0 : i32
    %c0_i32_1 = arith.constant 0 : i32
    return %arg0, %c0_i32, %c0_i32_0 : i32, i32, i32
  }
}

</mosaic_0001>

<bundles_post_ra>
// kernel: tpu_custom_call.1
= control target key start
LH: loop header
LB: loop body
LE: loop exit
PB: predicated region body
PF: predicated region fallthrough
CT: control target
= control target key end

     0   :  { %vm39_vm0 = vcmask 261120   ;;  %s851_s0 = inlined_call_operand.vmem [shape: f32[2,16,32], index: 0, kind: input, shape index: {}]   ;;  %s852_s1 = inlined_call_operand.vmem [shape: f32[2,16,1], index: 1, kind: input, shape index: {}]   ;;  %s853_s2 = inlined_call_operand.vmem [shape: f32[32,24], index: 2, kind: input, shape index: {}]   ;;  %s854_s3 = inlined_call_operand.vmem [shape: f32[1,24], index: 3, kind: input, shape index: {}]   ;;  %s855_s4 = inlined_call_operand.vmem [shape: f32[24,16], index: 4, kind: input, shape index: {}]   ;;  %s856_s5 = inlined_call_operand.vmem [shape: f32[16,16], index: 5, kind: input, shape index: {}]   ;;  %s857_s6 = inlined_call_operand.hbm [shape: f32[2,8,16], index: 6, kind: output, shape index: {}]  }
   0x1   :  { %v28_v0 = vld [vmem:[%s853_s2] sm:$0xff]  ;;  %v29_v1 = vld [vmem:[%s853_s2 + $0x8] sm:$0xff]  ;;  %v30_v2 = vld [vmem:[%s853_s2 + $0x10] sm:$0xff] }
   0x2   :  { %v661_v3 = vpack.c.bf16 %v29_v1, %v28_v0  ;;  %v31_v4 = vld [vmem:[%s853_s2 + $0x18] sm:$0xff]  ;;  %v24_v5 = vld [vmem:[%s851_s0] sm:$0xff]  ;;  %v138_v8 = vld [vmem:[%s855_s4 + $0x8] sm:$0xff] }
   0x3   :  { %v665_v6 = vpack.c.bf16 %v31_v4, %v30_v2  ;;  %629 = vmatprep.mubr.msk.f32.mxu0 %vm39_vm0, %v24_v5  ;;  %v137_v7 = vld [vmem:[%s855_s4] sm:$0xff] }
   0x4   :  { %662 = vmatprep.subr.bf16.mxu0 %v661_v3 }
   0x5   :  { %11 = vsyncpa [#allocation3], 0  ;;  %664 = vmatpush3.bf16.msra.mxu0 %v661_v3  ;;  %v669_v9 = vpack.c.bf16 %v138_v8, %v137_v7  ;;  %v25_v10 = vld [vmem:[%s851_s0 + $0x8] sm:$0xff]  ;;  %v26_v11 = vld [vmem:[%s851_s0 + $0x10] sm:$0xff]  ;;  %v724_v17 = vmov 0   ;;  %vm140_vm1 = vcmask 195584  }
   0x6   :  { %666 = vmatprep.subr.bf16.mxu0 %v665_v6  ;;  %v27_v12 = vld [vmem:[%s851_s0 + $0x18] sm:$0xff]  ;;  %v139_v13 = vld [vmem:[%s855_s4 + $0x10] sm:$0xff]  ;;  %v238_v14 = vld [vmem:[%s852_s1] sm:$0xff]  ;;  %686 = vset.pattern.permute.xlu0 %v724_v17  ;;  %vm274_vm2 = vcmask 130048   ;;  %s725_s28 = smov [#allocation2]  }
   0x7   :  { %670 = vmatprep.subr.bf16.mxu1 %v669_v9  ;;  %v240_v15 = vld [vmem:[%s852_s1 + $0x10] sm:$0xff]  ;;  %v239_v16 = vld [vmem:[%s852_s1 + $0x8] sm:$0xff]  ;;  %687 = vset.pattern.permute.xlu1 %v724_v17  ;;  %v242_v18 = vsub.f32 1.0, %v238_v14  ;;  %v241_v21 = vld [vmem:[%s852_s1 + $0x18] sm:$0xff]  ;;  %s574_s29 = sshll.u32 %s725_s28, 4  ;;  %s575_s29 = int_to_ptr.vmem [resolvable:$true] %s574_s29 }
   0x8   :  { %672 = vmatpush3.bf16.msra.mxu1 %v669_v9  ;;  %v244_v19 = vsub.f32 1.0, %v240_v15  ;;  %v243_v20 = vsub.f32 1.0, %v239_v16  ;;  %v245_v22 = vsub.f32 1.0, %v241_v21  ;;  %v585_v27 = vld [vmem:[%s854_s3] ss:$0 sm:$0xff]  ;;  %p705_p1 = scmp.lt.s32.totalorder %s575_s29, %s575_s29 }
   0x9   :  { %668 = vmatpush3.bf16.msra.mxu0 %v665_v6  ;;  %639 = vmatprep.subr.mxu1 %v139_v13  ;;  %v246_v23 = vmul.f32 -1e+08, %v242_v18 }
   0xa   :  { %v248_v24 = vmul.f32 -1e+08, %v244_v19  ;;  %v247_v25 = vmul.f32 -1e+08, %v243_v20  ;;  %v249_v26 = vmul.f32 -1e+08, %v245_v22 }
   0xb   :  { %252 = vperm.xlu0 %686, %v246_v23  }
   0xc   :  { %630 = vmatmul.mubr.msk.f32.vlgmr.msra.gmra.mrb[0].mxu0 %vm39_vm0, %v25_v10  ;;  %640 = vmatpush3.msra.mxu1 %v139_v13 }
   0xd   :  { %632 = vmatprep.mubr.msk.f32.mxu0 %vm39_vm0, %v26_v11  ;;  %262 = vperm.xlu1 %687, %v248_v24  }
   0xf   :  { %257 = vperm.xlu0 %686, %v247_v25  }
  0x10   :  { %633 = vmatmul.mubr.msk.f32.gmra.mrb[2].mxu0 %vm39_vm0, %v27_v12 }
  0x11   :  { %267 = vperm.xlu1 %687, %v249_v26  }
  0x8a   :  { %v253_v38 = vpop.permute.xlu0 %252 }
  0x8c   :  { %v263_v39 = vpop.permute.xlu1 %262 }
  0x8e   :  { %v258_v40 = vpop.permute.xlu0 %257 }
  0x90   :  { %v268_v46 = vpop.permute.xlu1 %267 }
  0xdf   :  { %v631_v28 = vpop.f32.mrb[0].mxu0 }
  0xe0   :  { %v124_v29 = vadd.f32 %v631_v28, %v585_v27  ;;  %v118_v30 = vpop.f32.mrb[1].mxu0 }
  0xe1   :  { %v119_v31 = vadd.f32 %v585_v27, %v118_v30 }
  0xe3   :  { %v673_v32 = vpack.c.bf16 %v124_v29, %v119_v31  ;;  %v634_v33 = vpop.f32.mrb[2].mxu0  ;;  %641 = vmatprep.mubr.msk.f32.mxu1 %vm140_vm1, %v119_v31 }
  0xe4   :  { %v134_v34 = vadd.f32 %v634_v33, %v585_v27  ;;  %v128_v35 = vpop.f32.mrb[3].mxu0  ;;  %642 = vmatmul.mubr.msk.f32.vlgmr.msra.gmra.mrb[0].mxu1 %vm140_vm1, %v124_v29 }
  0xe5   :  { %v129_v36 = vadd.f32 %v585_v27, %v128_v35  ;;  %674 = vmatprep.subr.bf16.mxu1 %v673_v32 }
  0xe6   :  { %676 = vmatpush3.bf16.msra.mxu1 %v673_v32 }
  0xe7   :  { %v677_v37 = vpack.c.bf16 %v134_v34, %v129_v36  ;;  %644 = vmatprep.mubr.msk.f32.mxu1 %vm140_vm1, %v129_v36 }
  0xe8   :  { %645 = vmatmul.mubr.msk.f32.gmra.mrb[2].mxu1 %vm140_vm1, %v134_v34 }
  0xe9   :  { %678 = vmatprep.subr.bf16.mxu0 %v677_v37 }
  0xea   :  { %680 = vmatpush3.bf16.msra.mxu0 %v677_v37 }
 0x1b7   :  { %v643_v41 = vpop.f32.mrb[0].mxu1 }
 0x1b8   :  { %v271_v42 = vadd.f32 %v643_v41, %v258_v40  ;;  %v219_v43 = vpop.f32.mrb[1].mxu1 }
 0x1b9   :  { %v270_v44 = vadd.f32 %v253_v38, %v219_v43 }
 0x1ba   :  { %v276_v45 = vsel %vm274_vm2, %v271_v42, -inf }
 0x1bb   :  { %v275_v47 = vsel %vm274_vm2, %v270_v44, -inf  ;;  %v646_v48 = vpop.f32.mrb[2].mxu1 }
 0x1bc   :  { %v277_v49 = vmax.f32 %v275_v47, %v276_v45  ;;  %v273_v50 = vadd.f32 %v646_v48, %v268_v46  ;;  %v229_v51 = vpop.f32.mrb[3].mxu1  ;;  %v555_v45 = vld [vmem:[%s856_s5] sm:$0xff] }
 0x1bd   :  { %v272_v52 = vadd.f32 %v263_v39, %v229_v51 }
 0x1be   :  { %v278_v53 = vrot.slane %v277_v49, 4  ;;  %v285_v54 = vsel %vm274_vm2, %v273_v50, -inf }
 0x1bf   :  { %v284_v55 = vsel %vm274_vm2, %v272_v52, -inf }
 0x1c0   :  { %v279_v56 = vmax.f32 %v277_v49, %v278_v53  ;;  %v286_v57 = vmax.f32 %v284_v55, %v285_v54 }
 0x1c2   :  { %v280_v58 = vrot.slane %v279_v56, 2  ;;  %v287_v59 = vrot.slane %v286_v57, 4 }
 0x1c4   :  { %v281_v60 = vmax.f32 %v279_v56, %v280_v58  ;;  %v288_v61 = vmax.f32 %v286_v57, %v287_v59 }
 0x1c6   :  { %v282_v62 = vrot.slane %v281_v60, 1  ;;  %v289_v63 = vrot.slane %v288_v61, 2 }
 0x1c8   :  { %v283_v0 = vmax.f32 %v281_v60, %v282_v62  ;;  %v290_v1 = vmax.f32 %v288_v61, %v289_v63 }
 0x1ca   :  { %v293_v2 = vsub.f32 %v270_v44, %v283_v0  ;;  %v294_v3 = vsub.f32 %v271_v42, %v283_v0  ;;  %v291_v4 = vrot.slane %v290_v1, 1  ;;  %v556_v44 = vld [vmem:[%s856_s5 + $0x8] sm:$0xff]  ;;  %s700_s5 = scalar_lea.vmem %s575_s29, 256 }
 0x1cb   :  { %p701_p0 = scmp.ne.s32.totalorder %s575_s29, %s700_s5  ;;  %p706_p2 = scmp.lt.s32.totalorder %s700_s5, %s700_s5 }
 0x1cc   :  { %v297_v5 = vmul.f32 1.442695, %v293_v2  ;;  %v299_v6 = vmul.f32 1.442695, %v294_v3  ;;  %v292_v7 = vmax.f32 %v290_v1, %v291_v4 }
 0x1cd   :  { %p707_p3 = por %p706_p2, %p705_p1 }
 0x1ce   :  { %688 = vpow2.f32 %v297_v5  ;;  %v295_v8 = vsub.f32 %v272_v52, %v292_v7  ;;  %v296_v9 = vsub.f32 %v273_v50, %v292_v7 }
 0x1cf   :  { %690 = vpow2.f32 %v299_v6  ;;  %p708_p4 = pnand %p707_p3, %p701_p0 }
 0x1d0   :  { %v301_v10 = vmul.f32 1.442695, %v295_v8  ;;  %v303_v11 = vmul.f32 1.442695, %v296_v9 }
 0x1d2   :  { %692 = vpow2.f32 %v301_v10 }
 0x1d3   :  { %694 = vpow2.f32 %v303_v11 }
 0x1d8   :  { %v689_v12 = vpop.eup %688 }
 0x1d9   :  { %v691_v13 = vpop.eup %690  ;;  %v305_v14 = vsel %vm274_vm2, %v689_v12, 0.0 }
 0x1da   :  { %v306_v15 = vsel %vm274_vm2, %v691_v13, 0.0 }
 0x1db   :  { %v307_v16 = vadd.f32 %v306_v15, %v305_v14 }
 0x1dc   :  { %v693_v17 = vpop.eup %692 }
 0x1dd   :  { %v695_v18 = vpop.eup %694  ;;  %v308_v19 = vrot.slane %v307_v16, 4  ;;  %v314_v20 = vsel %vm274_vm2, %v693_v17, 0.0 }
 0x1de   :  { %v315_v21 = vsel %vm274_vm2, %v695_v18, 0.0 }
 0x1df   :  { %v309_v22 = vadd.f32 %v308_v19, %v307_v16  ;;  %v316_v23 = vadd.f32 %v315_v21, %v314_v20 }
 0x1e1   :  { %v317_v24 = vrot.slane %v316_v23, 4  ;;  %v310_v25 = vrot.slane %v309_v22, 2 }
 0x1e3   :  { %v318_v26 = vadd.f32 %v317_v24, %v316_v23  ;;  %v311_v27 = vadd.f32 %v310_v25, %v309_v22 }
 0x1e5   :  { %v312_v28 = vrot.slane %v311_v27, 1  ;;  %v319_v29 = vrot.slane %v318_v26, 2 }
 0x1e7   :  { %v313_v30 = vadd.f32 %v312_v28, %v311_v27  ;;  %v320_v31 = vadd.f32 %v319_v29, %v318_v26 }
 0x1e9   :  { %696 = vrcp.f32 %v313_v30  ;;  %v321_v32 = vrot.slane %v320_v31, 1 }
 0x1eb   :  { %v322_v33 = vadd.f32 %v321_v32, %v320_v31 }
 0x1ed   :  { %698 = vrcp.f32 %v322_v33 }
 0x1f3   :  { %v697_v34 = vpop.eup %696 }
 0x1f4   :  { %v325_v35 = vmul.f32 %v697_v34, %v689_v12  ;;  %v326_v36 = vmul.f32 %v697_v34, %v691_v13 }
 0x1f6   :  { %329 = vxpose.xlu0.b32.start [1/2] (short) (narrow) %v325_v35, 16 }
 0x1f7   :  { %v699_v37 = vpop.eup %698 }
 0x1f8   :  { %v327_v38 = vmul.f32 %v699_v37, %v693_v17  ;;  %v328_v39 = vmul.f32 %v699_v37, %v695_v18 }
 0x1fa   :  { %330 = vxpose.xlu0.b32.end [2/2] (short) (narrow) %v326_v36, 16  ;;  %442 = vxpose.xlu1.b32.start [1/2] (short) (narrow) %v327_v38, 16 }
 0x1fe   :  { %443 = vxpose.xlu1.b32.end [2/2] (short) (narrow) %v328_v39, 16 }
 0x276   :  { %v345_v40 = vpop.trf.xlu0 }
 0x277   :  { %651 = vmatprep.mubr.msk.f32.mxu1 %vm274_vm2, %v345_v40 }
 0x27a   :  { %v458_v41 = vpop.trf.xlu1  ;;  %v346_v42 = vpop.trf.xlu0 }
 0x27b   :  { %658 = vmatprep.mubr.msk.f32.mxu0 %vm274_vm2, %v458_v41  ;;  %652 = vmatmul.mubr.msk.f32.vlgmr.msra.gmra.mrb[4].mxu1 %vm274_vm2, %v346_v42 }
 0x27e   :  { %v459_v43 = vpop.trf.xlu1 }
 0x27f   :  { %659 = vmatmul.mubr.msk.f32.vlgmr.msra.gmra.mrb[4].mxu0 %vm274_vm2, %v459_v43 }
 0x34e   :  { %v653_v46 = vpop.f32.mrb[4].mxu1 }
 0x34f   :  { %v558_v47 = vmul.f32 %v653_v46, %v556_v44  ;;  %v433_v48 = vpop.f32.mrb[5].mxu1 }
 0x350   :  { %v557_v49 = vmul.f32 %v555_v45, %v433_v48 }
 0x351   :  { %v562_v50 = vsel %vm274_vm2, %v558_v47, 0.0 }
 0x352   :  { %v561_v51 = vsel %vm274_vm2, %v557_v49, 0.0  ;;  %v660_v52 = vpop.f32.mrb[4].mxu0 }
 0x353   :  { %v563_v53 = vadd.f32 %v562_v50, %v561_v51  ;;  %v560_v54 = vmul.f32 %v660_v52, %v556_v44  ;;  %v546_v55 = vpop.f32.mrb[5].mxu0 }
 0x354   :  { %v559_v56 = vmul.f32 %v555_v45, %v546_v55 }
 0x355   :  { %567 = vst.msk [vmem:[#allocation2] sm:$0xff] %vm274_vm2, %v563_v53  ;;  %v565_v57 = vsel %vm274_vm2, %v560_v54, 0.0 }
 0x356   :  { %v564_v58 = vsel %vm274_vm2, %v559_v56, 0.0 }
 0x357   :  { %v566_v59 = vadd.f32 %v565_v57, %v564_v58 }
 0x359   :  { %568 = vst.msk [vmem:[#allocation2 + $0x8] sm:$0xff] %vm274_vm2, %v566_v59 }
 0x35a   :  { %711 = shalt.err (!%p708_p4)
}
 0x35b   :  { %s712_s8 = scalar_lea.hbm %s857_s6, 256 }
 0x35c   :  { %p713_p5 = scmp.ne.s32.totalorder %s857_s6, %s712_s8  ;;  %p716_p6 = scmp.lt.u32.totalorder %s712_s8, %s857_s6 }
 0x35e   :  { %p718_p7 = pnand %p716_p6, %p713_p5 }
 0x360   :  { %721 = shalt.err (!%p718_p7)
}
 0x361   :  { %s726_s12 = smov 128   ;;  %s727_s13 = smov 8  }
 0x362   :  { %580 = dma.vmem_to_hbm [thread:$0]  %s575_s29, 256, %s857_s6, [#allocation3], %s726_s12, %s726_s12, %s727_s13  }
 0x363   :  { %722 = dma.done.wait [#allocation3], 256  }
 0x364   :  { %723 = vsyncadd [#allocation3], 4294967040 }
 0x365   :  { %584 = vsyncpa [#allocation3], 1 }

</bundles_post_ra>
